<compile_context>
chip_gen: v6e
topology: v6e:2x2x1
jax: 0.10.0
libtpu: 0.0.40
codegen_flags: <defaults>
</compile_context>

<pallas_src>
import functools

import jax
import jax.numpy as jnp
from jax import lax
from jax.experimental import pallas as pl
from jax.experimental.pallas import tpu as pltpu

NEG_SLOPE = 0.01   # nn.LeakyReLU default
BN_EPS = 1e-5      # nn.BatchNorm2d default
LANE = 128


def _round_up(x, m):
    return (x + m - 1) // m * m


def _pick_row_tile(ho, wo, max_rows=512):
    """Largest divisor TR of Ho with TR*Wo a multiple of 128 and <= max_rows.

    Falls back to TR = Ho (full image per tile) when no divisor qualifies,
    which keeps every BlockSpec legal (block last dim == full dim)."""
    best = None
    for t in range(1, ho + 1):
        if ho % t:
            continue
        rows = t * wo
        if rows % LANE == 0 and rows <= max_rows:
            best = t
    return best if best is not None else ho


def _vmem_limit_bytes():
    # Size the scoped VMEM budget per generation (v7x: 64 MiB physical).
    try:
        info = pltpu.get_tpu_info()
        cap = getattr(info, "vmem_capacity_bytes", None)
        if cap:
            return min(int(cap) * 3 // 4, 100 * 1024 * 1024)
    except Exception:
        pass
    return 48 * 1024 * 1024


def _make_views(xp, ho, wo, view_dtype):
    """Six non-overlapping, row-tileable stride-2 phase views of the padded
    input, each exactly (N, Ho, Wo+1, Cin) in `view_dtype`.

    Taps map as: kh=0 -> (va, vb), kh=1 -> (vc, vd), kh=2 -> (ve, vf), where
    ve/vf are the even-row views shifted down by one row (the +1 row halo)."""
    wv = wo + 1

    def take(row_par, col_par, row_shift):
        v = xp[:, row_par::2, col_par::2, :]
        v = v[:, row_shift:row_shift + ho]
        if v.shape[2] < wv:
            v = jnp.pad(v, ((0, 0), (0, 0), (0, wv - v.shape[2]), (0, 0)))
        else:
            v = v[:, :, :wv]
        return v.astype(view_dtype)

    va = take(0, 0, 0)   # even rows, even cols   (kh=0, kw=0/2)
    vb = take(0, 1, 0)   # even rows, odd cols    (kh=0, kw=1)
    vc = take(1, 0, 0)   # odd rows,  even cols   (kh=1, kw=0/2)
    vd = take(1, 1, 0)   # odd rows,  odd cols    (kh=1, kw=1)
    ve = take(0, 0, 1)   # even rows +1, even cols (kh=2, kw=0/2)
    vf = take(0, 1, 1)   # even rows +1, odd cols  (kh=2, kw=1)
    return va, vb, vc, vd, ve, vf


def _conv_lrelu_kernel(va_ref, vb_ref, vc_ref, vd_ref, ve_ref, vf_ref,
                       w_ref, b_ref, y_ref, s_ref, sq_ref,
                       *, tr, wo, cin, cpad, cp8):
    """Per (batch, row-tile): 3x3/s2 conv as ONE K=9*Cin MXU matmul over the
    in-VMEM concatenation of the 9 tap patches, + bias + LeakyReLU; stores the
    tile channel-major (cp8, tr*wo) plus per-channel BN partial sums."""
    taps = ((va_ref, 0), (vb_ref, 0), (va_ref, 1),     # kh = 0
            (vc_ref, 0), (vd_ref, 0), (vc_ref, 1),     # kh = 1
            (ve_ref, 0), (vf_ref, 0), (ve_ref, 1))     # kh = 2
    patches = [ref[0, :, off:off + wo, :] for ref, off in taps]   # (tr, wo, cin)
    lhs = jnp.concatenate(patches, axis=-1).reshape(tr * wo, 9 * cin)
    y = jnp.dot(lhs, w_ref[...], preferred_element_type=jnp.float32)
    y = y + b_ref[...]                               # (tr*wo, cpad) + (1, cpad)
    y = jnp.where(y > 0, y, NEG_SLOPE * y)           # LeakyReLU
    # Per-tile per-channel partials for the *global* training-mode BN stats
    # (computed from the f32 y, before the storage-dtype cast).
    s_ref[...] = jnp.sum(y, axis=0).reshape(1, 1, 1, cpad)
    sq_ref[...] = jnp.sum(y * y, axis=0).reshape(1, 1, 1, cpad)
    # Channel-major store: keep only ceil8(Cout) channels, lane-dense rows.
    yt = jnp.transpose(y)[:cp8, :]                   # (cp8, tr*wo)
    y_ref[...] = yt.reshape(1, cp8, tr * wo).astype(y_ref.dtype)


def _bn_apply_kernel(y_ref, sc_ref, sh_ref, o_ref):
    """Pass 2: y * scale + shift with globally-reduced per-channel scale/shift,
    operating directly on the channel-major (1, cp8, tr*wo) tiles."""
    y = y_ref[...].astype(jnp.float32)               # (1, cp8, tr*wo)
    o_ref[...] = (y * sc_ref[...] + sh_ref[...]).astype(o_ref.dtype)


def downsample_forward(x_nchw, w_oihw, bias, gamma, beta, is_bn=True,
                       compute_dtype=jnp.bfloat16, out_dtype=jnp.float32,
                       row_tile=None):
    """Equivalent of Downsample.forward(x, is_bn). Returns NCHW `out_dtype`."""
    N, Cin, H, W = x_nchw.shape
    Cout = w_oihw.shape[0]
    Cpad = _round_up(max(Cout, LANE), LANE)   # matmul N-dim (lane-dense)
    # TODO(synk): on v6e/v7x round Cpad to 256 when Cout > 128 (2x256 MXU).
    Cp8 = _round_up(Cout, 8)                  # stored / BN-applied channels

    Ho = (H + 2 - 3) // 2 + 1
    Wo = (W + 2 - 3) // 2 + 1
    Wv = Wo + 1

    # --- NHWC + zero pad, then 6 row-tileable stride-2 phase views (bf16) ---
    x_nhwc = jnp.transpose(x_nchw, (0, 2, 3, 1)).astype(jnp.float32)
    xp = jnp.pad(x_nhwc, ((0, 0), (1, 1), (1, 1), (0, 0)))
    views = _make_views(xp, Ho, Wo, compute_dtype)

    # --- fused-tap weights (K = 9*Cin), channel-padded to lane-dense width ---
    w_k = jnp.transpose(w_oihw, (2, 3, 1, 0)).reshape(9 * Cin, Cout)
    w_k = jnp.pad(w_k, ((0, 0), (0, Cpad - Cout))).astype(compute_dtype)
    b_p = jnp.pad(bias, (0, Cpad - Cout)).reshape(1, Cpad).astype(jnp.float32)

    # --- tiling over the output rows of each image ---
    if row_tile is None:
        row_tile = _pick_row_tile(Ho, Wo)
    TR = row_tile
    assert Ho % TR == 0, (Ho, TR)
    TWo = TR * Wo
    assert TWo % 8 == 0, ("row tile * Wo must be sublane-aligned", TR, Wo)
    assert TWo % LANE == 0 or TR == Ho, \
        ("row tile * Wo must be a multiple of 128 (or cover the full image)",
         TR, Wo)
    RT = Ho // TR
    grid = (N, RT)

    y_dtype = compute_dtype if is_bn else out_dtype

    cparams = pltpu.CompilerParams(
        dimension_semantics=("parallel", "parallel"),
        vmem_limit_bytes=_vmem_limit_bytes())

    vb = jnp.dtype(compute_dtype).itemsize
    ce1 = pl.CostEstimate(
        flops=2 * 9 * Cin * Cpad * N * Ho * Wo,
        transcendentals=0,
        bytes_accessed=int(6 * N * Ho * Wv * Cin * vb + 9 * Cin * Cpad * vb
                           + N * Ho * Wo * Cp8 * jnp.dtype(y_dtype).itemsize
                           + 2 * N * RT * Cpad * 4))

    view_spec = pl.BlockSpec((1, TR, Wv, Cin), lambda n, r: (n, r, 0, 0))
    kern = functools.partial(_conv_lrelu_kernel, tr=TR, wo=Wo, cin=Cin,
                             cpad=Cpad, cp8=Cp8)
    y, psum, psumsq = pl.pallas_call(
        kern,
        grid=grid,
        in_specs=[view_spec] * 6 + [
            pl.BlockSpec((9 * Cin, Cpad), lambda n, r: (0, 0)),   # resident
            pl.BlockSpec((1, Cpad), lambda n, r: (0, 0)),         # resident
        ],
        out_specs=(
            pl.BlockSpec((1, Cp8, TWo), lambda n, r: (n, 0, r)),
            pl.BlockSpec((1, 1, 1, Cpad), lambda n, r: (n, r, 0, 0)),
            pl.BlockSpec((1, 1, 1, Cpad), lambda n, r: (n, r, 0, 0)),
        ),
        out_shape=(
            jax.ShapeDtypeStruct((N, Cp8, Ho * Wo), y_dtype),
            jax.ShapeDtypeStruct((N, RT, 1, Cpad), jnp.float32),
            jax.ShapeDtypeStruct((N, RT, 1, Cpad), jnp.float32),
        ),
        compiler_params=cparams,
        cost_estimate=ce1,
    )(*views, w_k, b_p)

    if is_bn:
        # Global batch statistics (training mode, biased variance).  Note the
        # stats come from the f32 conv output while pass 2 rescales the
        # (possibly bf16-rounded) stored y; difference is within bf16 noise.
        m_total = N * Ho * Wo
        mean = jnp.sum(psum, axis=(0, 1, 2)) / m_total
        var = jnp.maximum(
            jnp.sum(psumsq, axis=(0, 1, 2)) / m_total - mean * mean, 0.0)
        g_p = jnp.pad(gamma, (0, Cpad - Cout)).astype(jnp.float32)
        be_p = jnp.pad(beta, (0, Cpad - Cout)).astype(jnp.float32)
        inv = lax.rsqrt(var + BN_EPS)
        scale_c = (g_p * inv)[:Cp8].reshape(Cp8, 1)
        shift_c = (be_p - mean * g_p * inv)[:Cp8].reshape(Cp8, 1)

        ce2 = pl.CostEstimate(
            flops=2 * N * Ho * Wo * Cp8,
            transcendentals=0,
            bytes_accessed=int(N * Ho * Wo * Cp8 *
                               (jnp.dtype(y_dtype).itemsize +
                                jnp.dtype(out_dtype).itemsize)))
        y = pl.pallas_call(
            _bn_apply_kernel,
            grid=grid,
            in_specs=[
                pl.BlockSpec((1, Cp8, TWo), lambda n, r: (n, 0, r)),
                pl.BlockSpec((Cp8, 1), lambda n, r: (0, 0)),
                pl.BlockSpec((Cp8, 1), lambda n, r: (0, 0)),
            ],
            out_specs=pl.BlockSpec((1, Cp8, TWo), lambda n, r: (n, 0, r)),
            out_shape=jax.ShapeDtypeStruct((N, Cp8, Ho * Wo), out_dtype),
            compiler_params=cparams,
            cost_estimate=ce2,
        )(y, scale_c, shift_c)
    else:
        y = y.astype(out_dtype)

    # Already channel-major: only a metadata reshape + tiny channel slice left.
    y = y.reshape(N, Cp8, Ho, Wo)[:, :Cout]
    return y


def downsample_reference(x_nchw, w_oihw, bias, gamma, beta, is_bn=True):
    """Pure-JAX reference for correctness checking."""
    y = lax.conv_general_dilated(
        x_nchw, w_oihw, window_strides=(2, 2), padding=((1, 1), (1, 1)),
        dimension_numbers=("NCHW", "OIHW", "NCHW"))
    y = y + bias.reshape(1, -1, 1, 1)
    y = jnp.where(y > 0, y, NEG_SLOPE * y)
    if is_bn:
        mean = jnp.mean(y, axis=(0, 2, 3), keepdims=True)
        var = jnp.mean((y - mean) ** 2, axis=(0, 2, 3), keepdims=True)
        y = (y - mean) * lax.rsqrt(var + BN_EPS)
        y = y * gamma.reshape(1, -1, 1, 1) + beta.reshape(1, -1, 1, 1)
    return y


if __name__ == "__main__":
    key = jax.random.PRNGKey(0)
    (k_x, k_w, k_b, k_g, k_be,
     k_x2, k_w2, k_b2, k_g2, k_be2) = jax.random.split(key, 10)

    # --- base shape: N=2, Cin=4, Cout=8, 16x16 ---
    N, Cin, Cout, H, W = 2, 4, 8, 16, 16
    x = jax.random.normal(k_x, (N, Cin, H, W), dtype=jnp.float32)
    bound = 1.0 / (Cin * 9) ** 0.5
    w = jax.random.uniform(k_w, (Cout, Cin, 3, 3), jnp.float32, -bound, bound)
    b = jax.random.uniform(k_b, (Cout,), jnp.float32, -bound, bound)
    gamma = 1.0 + 0.1 * jax.random.normal(k_g, (Cout,), dtype=jnp.float32)
    beta = 0.1 * jax.random.normal(k_be, (Cout,), dtype=jnp.float32)

    ref_bn = downsample_reference(x, w, b, gamma, beta, is_bn=True)
    ref_nobn = downsample_reference(x, w, b, gamma, beta, is_bn=False)

    # 1) f32 path with BN.
    out = jax.block_until_ready(downsample_forward(
        x, w, b, gamma, beta, is_bn=True, compute_dtype=jnp.float32))
    assert out.shape == (N, Cout, H // 2, W // 2), out.shape
    assert float(jnp.max(jnp.abs(out - ref_bn))) < 2e-4

    # 2) is_bn=False path (conv + LeakyReLU only).
    out_nobn = jax.block_until_ready(downsample_forward(
        x, w, b, gamma, beta, is_bn=False, compute_dtype=jnp.float32))
    assert float(jnp.max(jnp.abs(out_nobn - ref_nobn))) < 2e-4

    # 3) Default optimized path: bf16 MXU matmul + bf16 views / intermediate.
    out_bf16 = jax.block_until_ready(downsample_forward(x, w, b, gamma, beta))
    assert float(jnp.max(jnp.abs(out_bf16 - ref_bn))) < 3e-2

    # 4) Multi-tile grid (RT=2) with Cout not a multiple of 8: exercises the
    #    row-tiled views, cross-tile/cross-batch BN statistics, and channel
    #    padding on the channel-major output path.
    N2, Cin2, Cout2, H2, W2 = 2, 4, 10, 32, 32
    x2 = jax.random.normal(k_x2, (N2, Cin2, H2, W2), dtype=jnp.float32)
    bound2 = 1.0 / (Cin2 * 9) ** 0.5
    w2 = jax.random.uniform(k_w2, (Cout2, Cin2, 3, 3), jnp.float32,
                            -bound2, bound2)
    b2 = jax.random.uniform(k_b2, (Cout2,), jnp.float32, -bound2, bound2)
    g2 = 1.0 + 0.1 * jax.random.normal(k_g2, (Cout2,), dtype=jnp.float32)
    be2 = 0.1 * jax.random.normal(k_be2, (Cout2,), dtype=jnp.float32)
    ref2 = downsample_reference(x2, w2, b2, g2, be2, is_bn=True)
    out2 = jax.block_until_ready(downsample_forward(
        x2, w2, b2, g2, be2, is_bn=True, compute_dtype=jnp.float32,
        row_tile=8))
    assert out2.shape == (N2, Cout2, H2 // 2, W2 // 2), out2.shape
    assert float(jnp.max(jnp.abs(out2 - ref2))) < 1e-3

    print("KERNEL_OK")
</pallas_src>

<mosaic_0001>
module attributes {stable_mosaic.version = 11 : i64} {
  func.func @_conv_lrelu_kernel(%arg0: i32, %arg1: i32, %arg2: memref<1x8x9x4xf32, #tpu.memory_space<vmem>>, %arg3: memref<1x8x9x4xf32, #tpu.memory_space<vmem>>, %arg4: memref<1x8x9x4xf32, #tpu.memory_space<vmem>>, %arg5: memref<1x8x9x4xf32, #tpu.memory_space<vmem>>, %arg6: memref<1x8x9x4xf32, #tpu.memory_space<vmem>>, %arg7: memref<1x8x9x4xf32, #tpu.memory_space<vmem>>, %arg8: memref<36x128xf32, #tpu.memory_space<vmem>>, %arg9: memref<1x128xf32, #tpu.memory_space<vmem>>, %arg10: memref<1x8x64xf32, #tpu.memory_space<vmem>>, %arg11: memref<1x1x1x128xf32, #tpu.memory_space<vmem>>, %arg12: memref<1x1x1x128xf32, #tpu.memory_space<vmem>>) attributes {dimension_semantics = [#tpu.dimension_semantics<parallel>, #tpu.dimension_semantics<parallel>], iteration_bounds = array<i64: 2, 1>, scalar_prefetch = 0 : i64, scratch_operands = 0 : i64, tpu.core_type = #tpu.core_type<tc>, window_params = [{transform_indices = @transform_0, window_bounds = array<i64: 1, 8, 9, 4>}, {transform_indices = @transform_1, window_bounds = array<i64: 1, 8, 9, 4>}, {transform_indices = @transform_2, window_bounds = array<i64: 1, 8, 9, 4>}, {transform_indices = @transform_3, window_bounds = array<i64: 1, 8, 9, 4>}, {transform_indices = @transform_4, window_bounds = array<i64: 1, 8, 9, 4>}, {transform_indices = @transform_5, window_bounds = array<i64: 1, 8, 9, 4>}, {pipeline_mode = #tpu.pipeline_mode<synchronous>, transform_indices = @transform_6, window_bounds = array<i64: 36, 128>}, {pipeline_mode = #tpu.pipeline_mode<synchronous>, transform_indices = @transform_7, window_bounds = array<i64: 1, 128>}, {transform_indices = @transform_8, window_bounds = array<i64: 1, 8, 64>}, {transform_indices = @transform_9, window_bounds = array<i64: 1, 1, 1, 128>}, {transform_indices = @transform_10, window_bounds = array<i64: 1, 1, 1, 128>}]} {
    %c0 = arith.constant 0 : index
    %c0_0 = arith.constant 0 : index
    %c0_1 = arith.constant 0 : index
    %c0_2 = arith.constant 0 : index
    %0 = vector.load %arg2[%c0, %c0_0, %c0_1, %c0_2] : memref<1x8x9x4xf32, #tpu.memory_space<vmem>>, vector<1x8x8x4xf32>
    %1 = vector.shape_cast %0 : vector<1x8x8x4xf32> to vector<8x8x4xf32>
    %c0_3 = arith.constant 0 : index
    %c0_4 = arith.constant 0 : index
    %c0_5 = arith.constant 0 : index
    %c0_6 = arith.constant 0 : index
    %2 = vector.load %arg3[%c0_3, %c0_4, %c0_5, %c0_6] : memref<1x8x9x4xf32, #tpu.memory_space<vmem>>, vector<1x8x8x4xf32>
    %3 = vector.shape_cast %2 : vector<1x8x8x4xf32> to vector<8x8x4xf32>
    %c0_7 = arith.constant 0 : index
    %c0_8 = arith.constant 0 : index
    %c1 = arith.constant 1 : index
    %c0_9 = arith.constant 0 : index
    %4 = vector.load %arg2[%c0_7, %c0_8, %c1, %c0_9] : memref<1x8x9x4xf32, #tpu.memory_space<vmem>>, vector<1x8x8x4xf32>
    %5 = vector.shape_cast %4 : vector<1x8x8x4xf32> to vector<8x8x4xf32>
    %c0_10 = arith.constant 0 : index
    %c0_11 = arith.constant 0 : index
    %c0_12 = arith.constant 0 : index
    %c0_13 = arith.constant 0 : index
    %6 = vector.load %arg4[%c0_10, %c0_11, %c0_12, %c0_13] : memref<1x8x9x4xf32, #tpu.memory_space<vmem>>, vector<1x8x8x4xf32>
    %7 = vector.shape_cast %6 : vector<1x8x8x4xf32> to vector<8x8x4xf32>
    %c0_14 = arith.constant 0 : index
    %c0_15 = arith.constant 0 : index
    %c0_16 = arith.constant 0 : index
    %c0_17 = arith.constant 0 : index
    %8 = vector.load %arg5[%c0_14, %c0_15, %c0_16, %c0_17] : memref<1x8x9x4xf32, #tpu.memory_space<vmem>>, vector<1x8x8x4xf32>
    %9 = vector.shape_cast %8 : vector<1x8x8x4xf32> to vector<8x8x4xf32>
    %c0_18 = arith.constant 0 : index
    %c0_19 = arith.constant 0 : index
    %c1_20 = arith.constant 1 : index
    %c0_21 = arith.constant 0 : index
    %10 = vector.load %arg4[%c0_18, %c0_19, %c1_20, %c0_21] : memref<1x8x9x4xf32, #tpu.memory_space<vmem>>, vector<1x8x8x4xf32>
    %11 = vector.shape_cast %10 : vector<1x8x8x4xf32> to vector<8x8x4xf32>
    %c0_22 = arith.constant 0 : index
    %c0_23 = arith.constant 0 : index
    %c0_24 = arith.constant 0 : index
    %c0_25 = arith.constant 0 : index
    %12 = vector.load %arg6[%c0_22, %c0_23, %c0_24, %c0_25] : memref<1x8x9x4xf32, #tpu.memory_space<vmem>>, vector<1x8x8x4xf32>
    %13 = vector.shape_cast %12 : vector<1x8x8x4xf32> to vector<8x8x4xf32>
    %c0_26 = arith.constant 0 : index
    %c0_27 = arith.constant 0 : index
    %c0_28 = arith.constant 0 : index
    %c0_29 = arith.constant 0 : index
    %14 = vector.load %arg7[%c0_26, %c0_27, %c0_28, %c0_29] : memref<1x8x9x4xf32, #tpu.memory_space<vmem>>, vector<1x8x8x4xf32>
    %15 = vector.shape_cast %14 : vector<1x8x8x4xf32> to vector<8x8x4xf32>
    %c0_30 = arith.constant 0 : index
    %c0_31 = arith.constant 0 : index
    %c1_32 = arith.constant 1 : index
    %c0_33 = arith.constant 0 : index
    %16 = vector.load %arg6[%c0_30, %c0_31, %c1_32, %c0_33] : memref<1x8x9x4xf32, #tpu.memory_space<vmem>>, vector<1x8x8x4xf32>
    %17 = vector.shape_cast %16 : vector<1x8x8x4xf32> to vector<8x8x4xf32>
    %18 = tpu.concatenate %1, %3, %5, %7, %9, %11, %13, %15, %17 in 2 : vector<8x8x4xf32>, vector<8x8x4xf32>, vector<8x8x4xf32>, vector<8x8x4xf32>, vector<8x8x4xf32>, vector<8x8x4xf32>, vector<8x8x4xf32>, vector<8x8x4xf32>, vector<8x8x4xf32> -> vector<8x8x36xf32>
    %19 = vector.shape_cast %18 : vector<8x8x36xf32> to vector<64x36xf32>
    %c0_34 = arith.constant 0 : index
    %c0_35 = arith.constant 0 : index
    %20 = vector.load %arg8[%c0_34, %c0_35] : memref<36x128xf32, #tpu.memory_space<vmem>>, vector<36x128xf32>
    %cst = arith.constant dense<0.000000e+00> : vector<64x128xf32>
    %21 = tpu.matmul %19, %20, %cst {dimension_numbers = #tpu.dot_dimension_numbers<[1], [0], [0], [1], [0, 0, 1, 1], [], []>} : vector<64x36xf32>, vector<36x128xf32>, vector<64x128xf32> -> vector<64x128xf32>
    %c0_36 = arith.constant 0 : index
    %c0_37 = arith.constant 0 : index
    %22 = vector.load %arg9[%c0_36, %c0_37] : memref<1x128xf32, #tpu.memory_space<vmem>>, vector<1x128xf32>
    %23 = vector.broadcast %22 : vector<1x128xf32> to vector<64x128xf32>
    %24 = arith.addf %21, %23 : vector<64x128xf32>
    %cst_38 = arith.constant 0.000000e+00 : f32
    %25 = vector.broadcast %cst_38 : f32 to vector<64x128xf32>
    %26 = arith.cmpf ogt, %24, %25 : vector<64x128xf32>
    %cst_39 = arith.constant 0.00999999977 : f32
    %27 = vector.broadcast %cst_39 : f32 to vector<64x128xf32>
    %28 = arith.mulf %27, %24 : vector<64x128xf32>
    %29 = arith.select %26, %24, %28 : vector<64x128xi1>, vector<64x128xf32>
    %cst_40 = arith.constant dense<0.000000e+00> : vector<128xf32>
    %30 = vector.multi_reduction <add>, %29, %cst_40 [0] : vector<64x128xf32> to vector<128xf32>
    %31 = vector.shape_cast %30 : vector<128xf32> to vector<1x1x1x128xf32>
    %c0_41 = arith.constant 0 : index
    %c0_42 = arith.constant 0 : index
    %c0_43 = arith.constant 0 : index
    %c0_44 = arith.constant 0 : index
    %32 = vector.load %arg11[%c0_41, %c0_42, %c0_43, %c0_44] : memref<1x1x1x128xf32, #tpu.memory_space<vmem>>, vector<1x1x1x128xf32>
    tpu.vector_store %arg11[%c0_41, %c0_42, %c0_43, %c0_44], %31 {strides = array<i32>} : memref<1x1x1x128xf32, #tpu.memory_space<vmem>>, vector<1x1x1x128xf32>,
    %33 = arith.mulf %29, %29 : vector<64x128xf32>
    %cst_45 = arith.constant dense<0.000000e+00> : vector<128xf32>
    %34 = vector.multi_reduction <add>, %33, %cst_45 [0] : vector<64x128xf32> to vector<128xf32>
    %35 = vector.shape_cast %34 : vector<128xf32> to vector<1x1x1x128xf32>
    %c0_46 = arith.constant 0 : index
    %c0_47 = arith.constant 0 : index
    %c0_48 = arith.constant 0 : index
    %c0_49 = arith.constant 0 : index
    %36 = vector.load %arg12[%c0_46, %c0_47, %c0_48, %c0_49] : memref<1x1x1x128xf32, #tpu.memory_space<vmem>>, vector<1x1x1x128xf32>
    tpu.vector_store %arg12[%c0_46, %c0_47, %c0_48, %c0_49], %35 {strides = array<i32>} : memref<1x1x1x128xf32, #tpu.memory_space<vmem>>, vector<1x1x1x128xf32>,
    %37 = tpu.transpose %29, [1, 0] : vector<64x128xf32> -> vector<128x64xf32>
    %38 = vector.extract_strided_slice %37 {offsets = [0, 0], sizes = [8, 64], strides = [1, 1]} : vector<128x64xf32> to vector<8x64xf32>
    %39 = vector.shape_cast %38 : vector<8x64xf32> to vector<1x8x64xf32>
    %c0_50 = arith.constant 0 : index
    %c0_51 = arith.constant 0 : index
    %c0_52 = arith.constant 0 : index
    %40 = vector.load %arg10[%c0_50, %c0_51, %c0_52] : memref<1x8x64xf32, #tpu.memory_space<vmem>>, vector<1x8x64xf32>
    tpu.vector_store %arg10[%c0_50, %c0_51, %c0_52], %39 {strides = array<i32>} : memref<1x8x64xf32, #tpu.memory_space<vmem>>, vector<1x8x64xf32>,
    return
  }
  func.func @transform_0(%arg0: i32, %arg1: i32) -> (i32, i32, i32, i32) {
    %c0_i32 = arith.constant 0 : i32
    %c0_i32_0 = arith.constant 0 : i32
    %c0_i32_1 = arith.constant 0 : i32
    return %arg0, %arg1, %c0_i32, %c0_i32_0 : i32, i32, i32, i32
  }
  func.func @transform_1(%arg0: i32, %arg1: i32) -> (i32, i32, i32, i32) {
    %c0_i32 = arith.constant 0 : i32
    %c0_i32_0 = arith.constant 0 : i32
    %c0_i32_1 = arith.constant 0 : i32
    return %arg0, %arg1, %c0_i32, %c0_i32_0 : i32, i32, i32, i32
  }
  func.func @transform_2(%arg0: i32, %arg1: i32) -> (i32, i32, i32, i32) {
    %c0_i32 = arith.constant 0 : i32
    %c0_i32_0 = arith.constant 0 : i32
    %c0_i32_1 = arith.constant 0 : i32
    return %arg0, %arg1, %c0_i32, %c0_i32_0 : i32, i32, i32, i32
  }
  func.func @transform_3(%arg0: i32, %arg1: i32) -> (i32, i32, i32, i32) {
    %c0_i32 = arith.constant 0 : i32
    %c0_i32_0 = arith.constant 0 : i32
    %c0_i32_1 = arith.constant 0 : i32
    return %arg0, %arg1, %c0_i32, %c0_i32_0 : i32, i32, i32, i32
  }
  func.func @transform_4(%arg0: i32, %arg1: i32) -> (i32, i32, i32, i32) {
    %c0_i32 = arith.constant 0 : i32
    %c0_i32_0 = arith.constant 0 : i32
    %c0_i32_1 = arith.constant 0 : i32
    return %arg0, %arg1, %c0_i32, %c0_i32_0 : i32, i32, i32, i32
  }
  func.func @transform_5(%arg0: i32, %arg1: i32) -> (i32, i32, i32, i32) {
    %c0_i32 = arith.constant 0 : i32
    %c0_i32_0 = arith.constant 0 : i32
    %c0_i32_1 = arith.constant 0 : i32
    return %arg0, %arg1, %c0_i32, %c0_i32_0 : i32, i32, i32, i32
  }
  func.func @transform_6(%arg0: i32, %arg1: i32) -> (i32, i32) {
    %c0_i32 = arith.constant 0 : i32
    %c0_i32_0 = arith.constant 0 : i32
    %c0_i32_1 = arith.constant 0 : i32
    return %c0_i32, %c0_i32_0 : i32, i32
  }
  func.func @transform_7(%arg0: i32, %arg1: i32) -> (i32, i32) {
    %c0_i32 = arith.constant 0 : i32
    %c0_i32_0 = arith.constant 0 : i32
    %c0_i32_1 = arith.constant 0 : i32
    return %c0_i32, %c0_i32_0 : i32, i32
  }
  func.func @transform_8(%arg0: i32, %arg1: i32) -> (i32, i32, i32) {
    %c0_i32 = arith.constant 0 : i32
    %c0_i32_0 = arith.constant 0 : i32
    return %arg0, %c0_i32, %arg1 : i32, i32, i32
  }
  func.func @transform_9(%arg0: i32, %arg1: i32) -> (i32, i32, i32, i32) {
    %c0_i32 = arith.constant 0 : i32
    %c0_i32_0 = arith.constant 0 : i32
    %c0_i32_1 = arith.constant 0 : i32
    return %arg0, %arg1, %c0_i32, %c0_i32_0 : i32, i32, i32, i32
  }
  func.func @transform_10(%arg0: i32, %arg1: i32) -> (i32, i32, i32, i32) {
    %c0_i32 = arith.constant 0 : i32
    %c0_i32_0 = arith.constant 0 : i32
    %c0_i32_1 = arith.constant 0 : i32
    return %arg0, %arg1, %c0_i32, %c0_i32_0 : i32, i32, i32, i32
  }
}

</mosaic_0001>

<bundles_post_ra>
// kernel: tpu_custom_call.1
= control target key start
LH: loop header
LB: loop body
LE: loop exit
PB: predicated region body
PF: predicated region fallthrough
CT: control target
= control target key end

     0   :  { %s2345_s0 = inlined_call_operand.vmem [shape: f32[2,8,9,4], index: 0, kind: input, shape index: {}]   ;;  %s2346_s1 = inlined_call_operand.vmem [shape: f32[2,8,9,4], index: 1, kind: input, shape index: {}]   ;;  %s2347_s2 = inlined_call_operand.vmem [shape: f32[2,8,9,4], index: 2, kind: input, shape index: {}]   ;;  %s2348_s3 = inlined_call_operand.vmem [shape: f32[2,8,9,4], index: 3, kind: input, shape index: {}]   ;;  %s2349_s4 = inlined_call_operand.vmem [shape: f32[2,8,9,4], index: 4, kind: input, shape index: {}]   ;;  %s2350_s5 = inlined_call_operand.vmem [shape: f32[2,8,9,4], index: 5, kind: input, shape index: {}]   ;;  %s2351_s6 = inlined_call_operand.vmem [shape: f32[36,128], index: 6, kind: input, shape index: {}]   ;;  %s2352_s7 = inlined_call_operand.vmem [shape: f32[1,128], index: 7, kind: input, shape index: {}]   ;;  %s2353_s8 = inlined_call_operand.hbm [shape: f32[2,8,64], index: 8, kind: output, shape index: {0}]   ;;  %s2354_s9 = inlined_call_operand.hbm [shape: f32[2,1,1,128], index: 9, kind: output, shape index: {1}]   ;;  %s2355_s10 = inlined_call_operand.hbm [shape: f32[2,1,1,128], index: 10, kind: output, shape index: {2}]  }
   0x1   :  { %2371 = sst [smem:[#allocation9_spill]] %s2345_s0 }
   0x2   :  { %2372 = sst [smem:[#allocation10_spill]] %s2346_s1 }
   0x3   :  { %2373 = sst [smem:[#allocation11_spill]] %s2347_s2 }
   0x4   :  { %2374 = sst [smem:[#allocation12_spill]] %s2348_s3 }
   0x5   :  { %2375 = sst [smem:[#allocation13_spill]] %s2349_s4 }
   0x6   :  { %16 = vsyncpa [#allocation3], 0 }
   0x7   :  { %18 = vsyncpa [#allocation3 + $0x1], 0 }
   0x8   :  { %19 = vsyncpa [#allocation5], 0 }
   0x9   :  { %21 = vsyncpa [#allocation5 + $0x1], 0  ;;  %s1893_s13 = smov 0   ;;  %s1895_s14 = smov 0  }
   0xa   :  { %s1897_s15 = smov 0   ;;  %s1899_s16 = smov 0  }
   0xb   :  { %s1901_s17 = smov 0   ;;  %s1903_s18 = smov 0  }
   0xc LB: > { %s2357_s19 = sadd.s32 4294967295, %s1825_s18   ;;  %s2356_s20 = sadd.s32 4294967294, %s1825_s18   ;;  %s1825_s18 = sphi %s1903_s18, %s27_s18   ;;  %s1821_s17 = sphi %s1901_s17, %s2398_s17   ;;  %s1817_s16 = sphi %s1899_s16, %s2397_s16   ;;  %s1813_s15 = sphi %s1897_s15, %s2396_s15   ;;  %s1809_s14 = sphi %s1895_s14, %s2395_s14   ;;  %s1805_s13 = sphi %s1893_s13, %s2394_s13  }
   0xd   : > { %s39_s21 = sadd.s32 1, %s1821_s17  ;;  %s258_s22 = sadd.s32 1, %s1813_s15 }
   0xe   : > { %p41_p0 = scmp.ge.s32.totalorder %s39_s21, 2  ;;  %p268_p1 = scmp.ne.s32.totalorder %s1813_s15, %s1809_s14 }
   0xf   : > { %p269_p2 = scmp.eq.s32.totalorder %s2357_s19, 1  ;;  %p274_p3 = scmp.ne.s32.totalorder %s1809_s14, %s1805_s13 }
  0x10   : > { %s2400_s21 = smov (%p41_p0, %s39_s21), 0  ;;  %p275_p5 = scmp.eq.s32.totalorder %s2356_s20, 1 }
  0x11   : > { %p1935_p4 = por %p269_p2, %p268_p1  ;;  %s253_s24 = ssub.s32 %s1821_s17, %s2400_s21 }
  0x12   : > { %p1538_p6 = scmp.ge.s32.totalorder %s1825_s18, 1  ;;  %p256_p7 = scmp.eq.s32.totalorder %s253_s24, 0 }
  0x13   : > { %p1944_p8 = por %p275_p5, %p274_p3  ;;  %p439_p9 = scmp.lt.s32.totalorder %s1825_s18, 3 }
  0x14   : > { %s1950_s26 = scalar_select %p256_p7, %s1813_s15, %s258_s22  }
  0x15   : > { %p440_p10 = pnand %p1538_p6, %p439_p9 }
  0x16   : > { %p541_p11 = scmp.lt.s32.totalorder (!%p440_p10), %s1817_s16, 1  ;;  %s2378_s1 = sld [smem:[#allocation10_spill]] (!%p440_p10) }
  0x17   : > { %443 = sbr.rel (%p440_p10) target bundleno = 588 (0x24c), region = 52  ;;  %s2379_s0 = sld [smem:[#allocation9_spill]] (!%p440_p10) }
  0x18   : > { %s2360_s29 = smov (!%p440_p10), 8   ;;  %s2380_s2 = sld [smem:[#allocation11_spill]] (!%p440_p10) }
  0x19   : > { %s2381_s3 = sld [smem:[#allocation12_spill]] (!%p440_p10)  ;;  %s2358_s20 = smov (!%p440_p10), 12  }
  0x1a   : > { %s2362_s30 = smov (!%p440_p10), 16   ;;  %s2366_s12 = smov (!%p440_p10), 20  }
  0x1b   : > { %s2382_s4 = sld [smem:[#allocation13_spill]] (!%p440_p10) }
  0x1c   : > { %s542_s27 = scalar_select %p541_p11, %s1817_s16, 1  ;;  %v1010_v14 = vld [vmem:[%s2351_s6 + $0x20] sm:$0xf]  ;;  %vm1043_vm0 = vcmask 1043456   ;;  %v1009_v17 = vld [vmem:[%s2351_s6 + $0x18] sm:$0xff]  ;;  %v1008_v19 = vld [vmem:[%s2351_s6 + $0x10] sm:$0xff] }
  0x1d   : > { %1587 = vmatprep.subr.msk.mxu0 %vm1043_vm0, %v1010_v14  ;;  %1609 = vmatprep.subr.msk.mxu1 %vm1043_vm0, %v1010_v14  ;;  %v1007_v21 = vld [vmem:[%s2351_s6 + $0x8] sm:$0xff]  ;;  %v1006_v22 = vld [vmem:[%s2351_s6] sm:$0xff]  ;;  %vm934_vm1 = vcmask 31744   ;;  %vm943_vm2 = vcmask 64512   ;;  %vm952_vm3 = vcmask 97280   ;;  %vm961_vm4 = vcmask 130048  }
  0x1e   : > { %s1954_s28 = sshll.u32 %s542_s27, 7  ;;  %s2364_s27 = smov 4   ;;  %1588 = vmatpush3.msk.msra.mxu0 %vm1043_vm0, %v1010_v14  ;;  %1614 = vmatpush3.msk.msra.mxu1 %vm1043_vm0, %v1010_v14  ;;  %vm970_vm5 = vcmask 162816   ;;  %vm979_vm6 = vcmask 195584   ;;  %vm988_vm7 = vcmask 228352   ;;  %vm997_vm8 = vcmask 261120  }
  0x1f   : > { %s1960_s11 = scalar_lea.vmem %s2378_s1, %s1954_s28  ;;  %s1967_s24 = scalar_lea.vmem %s2379_s0, %s1954_s28  ;;  %1589 = vmatprep.subr.mxu0 %v1009_v17  ;;  %1610 = vmatprep.subr.mxu1 %v1009_v17  ;;  %vm1018_vm9 = vcmask 293888  }
  0x20   : > { %v614_v0 = vld [vmem:[%s1960_s11] sm:$0xff]  ;;  %v615_v2 = vld [vmem:[%s1960_s11 + $0x10] sm:$0xff]  ;;  %s1977_s19 = scalar_lea.vmem %s2380_s2, %s1954_s28  ;;  %s1988_s0 = scalar_lea.vmem %s2381_s3, %s1954_s28  ;;  %1590 = vmatpush3.msra.mxu0 %v1009_v17  ;;  %1615 = vmatpush3.msra.mxu1 %v1009_v17 }
  0x21   : > { %686 = vrot.lane.b32.xlu0 %v614_v0, %s2364_s27  ;;  %v622_v1 = vld [vmem:[%s1967_s24 + $0x1] sm:$0xff]  ;;  %v623_v3 = vld [vmem:[%s1967_s24 + $0x11] sm:$0xff]  ;;  %s2383_s1 = smov 8   ;;  %s2368_s3 = smov 24   ;;  %1591 = vmatprep.subr.mxu0 %v1008_v19 }
  0x22   : > { %718 = vrot.lane.b32.xlu1 %v622_v1, %s2360_s29  ;;  %v630_v4 = vld [vmem:[%s1977_s19] sm:$0xff]  ;;  %v631_v5 = vld [vmem:[%s1977_s19 + $0x10] sm:$0xff]  ;;  %s2384_s2 = smov 12   ;;  %1592 = vmatpush3.msra.mxu0 %v1008_v19 }
  0x23   : > { %v638_v6 = vld [vmem:[%s1988_s0] sm:$0xff]  ;;  %v639_v8 = vld [vmem:[%s1988_s0 + $0x10] sm:$0xff]  ;;  %1611 = vmatprep.subr.mxu1 %v1008_v19  ;;  %1593 = vmatprep.subr.mxu0 %v1007_v21 }
  0x24   : > { %v616_v7 = vld [vmem:[%s1960_s11 + $0x20] sm:$0xff]  ;;  %v617_v10 = vld [vmem:[%s1960_s11 + $0x30] sm:$0xff]  ;;  %1594 = vmatpush3.msra.mxu0 %v1007_v21  ;;  %1616 = vmatpush3.msra.mxu1 %v1008_v19 }
  0x25   : > { %688 = vrot.lane.b32.xlu0 %v615_v2, %s2364_s27  ;;  %v646_v9 = vld [vmem:[%s1977_s19 + $0x1] sm:$0xff]  ;;  %v647_v12 = vld [vmem:[%s1977_s19 + $0x11] sm:$0xff]  ;;  %1595 = vmatprep.subr.mxu0 %v1006_v22 }
  0x26   : > { %720 = vrot.lane.b32.xlu1 %v623_v3, %s2360_s29  ;;  %v624_v11 = vld [vmem:[%s1967_s24 + $0x21] sm:$0xff]  ;;  %s2006_s29 = scalar_lea.vmem %s2382_s4, %s1954_s28  ;;  %v625_v15 = vld [vmem:[%s1967_s24 + $0x31] sm:$0xff]  ;;  %s2385_s4 = smov 24   ;;  %1612 = vmatprep.subr.mxu1 %v1007_v21 }
  0x27   : > { %v654_v13 = vld [vmem:[%s2006_s29] sm:$0xff]  ;;  %v655_v18 = vld [vmem:[%s2006_s29 + $0x10] sm:$0xff]  ;;  %1596 = vmatpush3.msra.mxu0 %v1006_v22  ;;  %1617 = vmatpush3.msra.mxu1 %v1007_v21 }
  0x28   : > { %v632_v16 = vld [vmem:[%s1977_s19 + $0x20] sm:$0xff]  ;;  %v633_v23 = vld [vmem:[%s1977_s19 + $0x30] sm:$0xff]  ;;  %1613 = vmatprep.subr.mxu1 %v1006_v22 }
  0x29   : > { %750 = vrot.lane.b32.xlu0 %v630_v4, %s2358_s20  ;;  %v640_v24 = vld [vmem:[%s1988_s0 + $0x20] sm:$0xff]  ;;  %1618 = vmatpush3.msra.mxu1 %v1006_v22  ;;  %v641_v28 = vld [vmem:[%s1988_s0 + $0x30] sm:$0xff] }
  0x2a   : > { %752 = vrot.lane.b32.xlu1 %v631_v5, %s2358_s20  ;;  %v670_v26 = vld [vmem:[%s2006_s29 + $0x1] sm:$0xff]  ;;  %v671_v30 = vld [vmem:[%s2006_s29 + $0x11] sm:$0xff]  ;;  %s2388_s20 = smov 20  }
  0x2b   : > { %v618_v27 = vld [vmem:[%s1960_s11 + $0x40] sm:$0xff]  ;;  %v619_v31 = vld [vmem:[%s1960_s11 + $0x50] sm:$0xff] }
  0x2c   : > { %v648_v29 = vld [vmem:[%s1977_s19 + $0x21] sm:$0xff]  ;;  %v649_v33 = vld [vmem:[%s1977_s19 + $0x31] sm:$0xff] }
  0x2d   : > { %782 = vrot.lane.b32.xlu0 %v638_v6, %s2362_s30  ;;  %v626_v32 = vld [vmem:[%s1967_s24 + $0x41] sm:$0xff]  ;;  %v627_v35 = vld [vmem:[%s1967_s24 + $0x51] sm:$0xff] }
  0x2e   : > { %690 = vrot.lane.b32.xlu1 %v616_v7, %s2364_s27  ;;  %v656_v34 = vld [vmem:[%s2006_s29 + $0x20] sm:$0xff]  ;;  %v657_v37 = vld [vmem:[%s2006_s29 + $0x30] sm:$0xff] }
  0x2f   : > { %v634_v36 = vld [vmem:[%s1977_s19 + $0x40] sm:$0xff]  ;;  %v635_v39 = vld [vmem:[%s1977_s19 + $0x50] sm:$0xff] }
  0x30   : > { %v642_v40 = vld [vmem:[%s1988_s0 + $0x40] sm:$0xff]  ;;  %v643_v44 = vld [vmem:[%s1988_s0 + $0x50] sm:$0xff] }
  0x31   : > { %784 = vrot.lane.b32.xlu0 %v639_v8, %s2362_s30  ;;  %s2386_s30 = smov 16   ;;  %v672_v42 = vld [vmem:[%s2006_s29 + $0x21] sm:$0xff]  ;;  %v673_v46 = vld [vmem:[%s2006_s29 + $0x31] sm:$0xff] }
  0x32   : > { %814 = vrot.lane.b32.xlu1 %v646_v9, %s2366_s12  ;;  %v620_v43 = vld [vmem:[%s1960_s11 + $0x60] sm:$0xff]  ;;  %v621_v47 = vld [vmem:[%s1960_s11 + $0x70] sm:$0xff]  ;;  %s2389_s11 = sadd.s32 4294967295, %s1825_s18  }
  0x33   : > { %v650_v45 = vld [vmem:[%s1977_s19 + $0x41] sm:$0xff]  ;;  %v651_v49 = vld [vmem:[%s1977_s19 + $0x51] sm:$0xff] }
  0x34   : > { %v628_v48 = vld [vmem:[%s1967_s24 + $0x61] sm:$0xff]  ;;  %v629_v51 = vld [vmem:[%s1967_s24 + $0x71] sm:$0xff] }
  0x35   : > { %692 = vrot.lane.b32.xlu0 %v617_v10, %s2364_s27  ;;  %s2023_s27 = scalar_lea.vmem %s2350_s5, %s1954_s28  ;;  %s1834_s28 = smov 32   ;;  %v658_v50 = vld [vmem:[%s2006_s29 + $0x40] sm:$0xff]  ;;  %v659_v53 = vld [vmem:[%s2006_s29 + $0x50] sm:$0xff] }
  0x36   : > { %722 = vrot.lane.b32.xlu1 %v624_v11, %s2383_s1  ;;  %v662_v20 = vld [vmem:[%s2023_s27] sm:$0xff]  ;;  %v663_v25 = vld [vmem:[%s2023_s27 + $0x10] sm:$0xff] }
  0x37   : > { %v664_v38 = vld [vmem:[%s2023_s27 + $0x20] sm:$0xff]  ;;  %v665_v41 = vld [vmem:[%s2023_s27 + $0x30] sm:$0xff] }
  0x38   : > { %v636_v52 = vld [vmem:[%s1977_s19 + $0x60] sm:$0xff]  ;;  %v637_v55 = vld [vmem:[%s1977_s19 + $0x70] sm:$0xff] }
  0x39   : > { %816 = vrot.lane.b32.xlu0 %v647_v12, %s2366_s12  ;;  %s2387_s12 = smov 4   ;;  %v666_v54 = vld [vmem:[%s2023_s27 + $0x40] sm:$0xff]  ;;  %v667_v57 = vld [vmem:[%s2023_s27 + $0x50] sm:$0xff] }
  0x3a   : > { %846 = vrot.lane.b32.xlu1 %v654_v13, %s2368_s3  ;;  %s1833_s3 = smov 28   ;;  %v644_v56 = vld [vmem:[%s1988_s0 + $0x60] sm:$0xff]  ;;  %v645_v59 = vld [vmem:[%s1988_s0 + $0x70] sm:$0xff] }
  0x3b   : > { %v674_v58 = vld [vmem:[%s2006_s29 + $0x41] sm:$0xff]  ;;  %v675_v61 = vld [vmem:[%s2006_s29 + $0x51] sm:$0xff] }
  0x3c   : > { %v652_v60 = vld [vmem:[%s1977_s19 + $0x61] sm:$0xff]  ;;  %v653_v62 = vld [vmem:[%s1977_s19 + $0x71] sm:$0xff]  ;;  %s2225_s19 = sand.u32 1, %s1809_s14  }
  0x3d   : > { %724 = vrot.lane.b32.xlu0 %v625_v15, %s2383_s1  ;;  %v660_v63 = vld [vmem:[%s2006_s29 + $0x60] sm:$0xff]  ;;  %v661_v1 = vld [vmem:[%s2006_s29 + $0x70] sm:$0xff] }
  0x3e   : > { %754 = vrot.lane.b32.xlu1 %v632_v16, %s2384_s2  ;;  %v668_v3 = vld [vmem:[%s2023_s27 + $0x60] sm:$0xff]  ;;  %v669_v5 = vld [vmem:[%s2023_s27 + $0x70] sm:$0xff]  ;;  %s1564_s27 = sshll.u32 %s1817_s16, 4 }
  0x3f   : > { %v676_v7 = vld [vmem:[%s2006_s29 + $0x61] sm:$0xff]  ;;  %v677_v9 = vld [vmem:[%s2006_s29 + $0x71] sm:$0xff]  ;;  %s533_s29 = scalar_lea.vmem [#allocation4], %s2225_s19  ;;  %s2246_s0 = scalar_lea.hbm %s2355_s10, %s1564_s27 }
  0x40   : > { %v606_v21 = vld [vmem:[%s1967_s24] sm:$0xff] }
  0x41   : > { %848 = vrot.lane.b32.xlu0 %v655_v18, %s2385_s4 }
  0x42   : > { %878 = vrot.lane.b32.xlu1 %v662_v20, %s1833_s3 }
  0x45   : > { %756 = vrot.lane.b32.xlu0 %v633_v23, %s2384_s2 }
  0x46   : > { %786 = vrot.lane.b32.xlu1 %v640_v24, %s2386_s30 }
  0x49   : > { %880 = vrot.lane.b32.xlu0 %v663_v25, %s1833_s3 }
  0x4a   : > { %910 = vrot.lane.b32.xlu1 %v670_v26, %s1834_s28 }
  0x4d   : > { %694 = vrot.lane.b32.xlu0 %v618_v27, %s2387_s12 }
  0x4e   : > { %788 = vrot.lane.b32.xlu1 %v641_v28, %s2386_s30 }
  0x51   : > { %818 = vrot.lane.b32.xlu0 %v648_v29, %s2388_s20  ;;  %v607_v29 = vld [vmem:[%s1967_s24 + $0x10] sm:$0xff] }
  0x52   : > { %912 = vrot.lane.b32.xlu1 %v671_v30, %s1834_s28 }
  0x55   : > { %696 = vrot.lane.b32.xlu0 %v619_v31, %s2387_s12 }
  0x56   : > { %726 = vrot.lane.b32.xlu1 %v626_v32, %s2383_s1 }
  0x59   : > { %820 = vrot.lane.b32.xlu0 %v649_v33, %s2388_s20 }
  0x5a   : > { %850 = vrot.lane.b32.xlu1 %v656_v34, %s2385_s4 }
  0x5d   : > { %728 = vrot.lane.b32.xlu0 %v627_v35, %s2383_s1 }
  0x5e   : > { %758 = vrot.lane.b32.xlu1 %v634_v36, %s2384_s2 }
  0x61   : > { %852 = vrot.lane.b32.xlu0 %v657_v37, %s2385_s4 }
  0x62   : > { %882 = vrot.lane.b32.xlu1 %v664_v38, %s1833_s3 }
  0x65   : > { %760 = vrot.lane.b32.xlu0 %v635_v39, %s2384_s2 }
  0x66   : > { %790 = vrot.lane.b32.xlu1 %v642_v40, %s2386_s30 }
  0x69   : > { %884 = vrot.lane.b32.xlu0 %v665_v41, %s1833_s3 }
  0x6a   : > { %914 = vrot.lane.b32.xlu1 %v672_v42, %s1834_s28 }
  0x6d   : > { %698 = vrot.lane.b32.xlu0 %v620_v43, %s2387_s12 }
  0x6e   : > { %792 = vrot.lane.b32.xlu1 %v643_v44, %s2386_s30 }
  0x71   : > { %822 = vrot.lane.b32.xlu0 %v650_v45, %s2388_s20 }
  0x72   : > { %916 = vrot.lane.b32.xlu1 %v673_v46, %s1834_s28 }
  0x75   : > { %700 = vrot.lane.b32.xlu0 %v621_v47, %s2387_s12 }
  0x76   : > { %730 = vrot.lane.b32.xlu1 %v628_v48, %s2383_s1 }
  0x79   : > { %824 = vrot.lane.b32.xlu0 %v651_v49, %s2388_s20 }
  0x7a   : > { %854 = vrot.lane.b32.xlu1 %v658_v50, %s2385_s4 }
  0x7d   : > { %732 = vrot.lane.b32.xlu0 %v629_v51, %s2383_s1 }
  0x7e   : > { %762 = vrot.lane.b32.xlu1 %v636_v52, %s2384_s2 }
  0x81   : > { %856 = vrot.lane.b32.xlu0 %v659_v53, %s2385_s4 }
  0x82   : > { %886 = vrot.lane.b32.xlu1 %v666_v54, %s1833_s3 }
  0x85   : > { %764 = vrot.lane.b32.xlu0 %v637_v55, %s2384_s2  ;;  %v608_v55 = vld [vmem:[%s1967_s24 + $0x20] sm:$0xff]  ;;  %s1283_s2 = sshll.u32 %s533_s29, 4  ;;  %s2241_s2 = int_to_ptr.vmem [resolvable:$true] %s1283_s2 }
  0x86   : > { %794 = vrot.lane.b32.xlu1 %v644_v56, %s2386_s30 }
  0x89   : > { %888 = vrot.lane.b32.xlu0 %v667_v57, %s1833_s3 }
  0x8a   : > { %918 = vrot.lane.b32.xlu1 %v674_v58, %s1834_s28 }
  0x8d   : > { %796 = vrot.lane.b32.xlu0 %v645_v59, %s2386_s30 }
  0x8e   : > { %826 = vrot.lane.b32.xlu1 %v652_v60, %s2388_s20 }
  0x91   : > { %920 = vrot.lane.b32.xlu0 %v675_v61, %s1834_s28 }
  0x92   : > { %828 = vrot.lane.b32.xlu1 %v653_v62, %s2388_s20 }
  0x93   : > { %v687_v0 = vpop.permute.xlu0 %686 }
  0x94   : > { %v719_v2 = vpop.permute.xlu1 %718  ;;  %v935_v23 = vsel %vm934_vm1, %v606_v21, %v687_v0 }
  0x95   : > { %858 = vrot.lane.b32.xlu0 %v660_v63, %s2385_s4  ;;  %v944_v25 = vsel %vm943_vm2, %v935_v23, %v719_v2 }
  0x96   : > { %860 = vrot.lane.b32.xlu1 %v661_v1, %s2385_s4  ;;  %v609_v1 = vld [vmem:[%s1967_s24 + $0x30] sm:$0xff]  ;;  %s2370_s4 = scalar_lea.vmem [#allocation6], %s2225_s19 }
  0x97   : > { %v689_v4 = vpop.permute.xlu0 %688  ;;  %s1297_s22 = sshll.u32 %s2370_s4, 4  ;;  %s2248_s22 = int_to_ptr.vmem [resolvable:$true] %s1297_s22 }
  0x98   : > { %v721_v6 = vpop.permute.xlu1 %720  ;;  %v936_v34 = vsel %vm934_vm1, %v607_v29, %v689_v4 }
  0x99   : > { %890 = vrot.lane.b32.xlu0 %v668_v3, %s1833_s3  ;;  %v945_v38 = vsel %vm943_vm2, %v936_v34, %v721_v6  ;;  %v611_v34 = vld [vmem:[%s1967_s24 + $0x50] sm:$0xff] }
  0x9a   : > { %892 = vrot.lane.b32.xlu1 %v669_v5, %s1833_s3  ;;  %s1835_s3 = smov [#allocation4]  }
  0x9b   : > { %v751_v8 = vpop.permute.xlu0 %750  ;;  %s1697_s30 = sshll.u32 %s1835_s3, 4  ;;  %s1698_s30 = int_to_ptr.vmem [resolvable:$false] %s1697_s30 }
  0x9c   : > { %v753_v10 = vpop.permute.xlu1 %752  ;;  %v953_v27 = vsel %vm952_vm3, %v944_v25, %v751_v8  ;;  %v610_v25 = vld [vmem:[%s1967_s24 + $0x40] sm:$0xff]  ;;  %s1699_s4 = scalar_lea.vmem %s1698_s30, 32  ;;  %p1700_p1 = scmp.lt.s32.totalorder %s2241_s2, %s1698_s30 }
  0x9d   : > { %922 = vrot.lane.b32.xlu0 %v676_v7, %s1834_s28  ;;  %v954_v40 = vsel %vm952_vm3, %v945_v38, %v753_v10 }
  0x9e   : > { %924 = vrot.lane.b32.xlu1 %v677_v9, %s1834_s28  ;;  %s2239_s28 = scalar_lea.hbm %s2354_s9, %s1564_s27 }
  0x9f   : > { %v783_v11 = vpop.permute.xlu0 %782 }
  0xa0   : > { %v691_v12 = vpop.permute.xlu1 %690  ;;  %v962_v30 = vsel %vm961_vm4, %v953_v27, %v783_v11 }
  0xa1   : > { %v937_v58 = vsel %vm934_vm1, %v608_v55, %v691_v12 }
  0xa3   : > { %v785_v13 = vpop.permute.xlu0 %784 }
  0xa4   : > { %v815_v14 = vpop.permute.xlu1 %814  ;;  %v963_v42 = vsel %vm961_vm4, %v954_v40, %v785_v13 }
  0xa5   : > { %v971_v31 = vsel %vm970_vm5, %v962_v30, %v815_v14 }
  0xa7   : > { %v2135_v15 = vpop.permute.xlu0 %692 }
  0xa8   : > { %v723_v16 = vpop.permute.xlu1 %722  ;;  %v938_v7 = vsel %vm934_vm1, %v609_v1, %v2135_v15 }
  0xa9   : > { %v946_v59 = vsel %vm943_vm2, %v937_v58, %v723_v16 }
  0xab   : > { %v817_v17 = vpop.permute.xlu0 %816 }
  0xac   : > { %v847_v18 = vpop.permute.xlu1 %846  ;;  %v972_v43 = vsel %vm970_vm5, %v963_v42, %v817_v17 }
  0xad   : > { %v980_v32 = vsel %vm979_vm6, %v971_v31, %v847_v18 }
  0xaf   : > { %v2137_v19 = vpop.permute.xlu0 %724 }
  0xb0   : > { %v755_v20 = vpop.permute.xlu1 %754  ;;  %v947_v8 = vsel %vm943_vm2, %v938_v7, %v2137_v19 }
  0xb1   : > { %v955_v61 = vsel %vm952_vm3, %v946_v59, %v755_v20 }
  0xb3   : > { %v849_v22 = vpop.permute.xlu0 %848 }
  0xb4   : > { %v879_v24 = vpop.permute.xlu1 %878  ;;  %v981_v44 = vsel %vm979_vm6, %v972_v43, %v849_v22 }
  0xb5   : > { %v989_v35 = vsel %vm988_vm7, %v980_v32, %v879_v24 }
  0xb7   : > { %v757_v26 = vpop.permute.xlu0 %756 }
  0xb8   : > { %v787_v28 = vpop.permute.xlu1 %786  ;;  %v956_v10 = vsel %vm952_vm3, %v947_v8, %v757_v26 }
  0xb9   : > { %v964_v63 = vsel %vm961_vm4, %v955_v61, %v787_v28 }
  0xbb   : > { %v881_v33 = vpop.permute.xlu0 %880 }
  0xbc   : > { %v911_v36 = vpop.permute.xlu1 %910  ;;  %v990_v46 = vsel %vm988_vm7, %v981_v44, %v881_v33 }
  0xbd   : > { %v998_v37 = vsel %vm997_vm8, %v989_v35, %v911_v36 }
  0xbe   : > { %1597 = vmatprep.mubr.msk.f32.mxu0 %vm1018_vm9, %v998_v37 }
  0xbf   : > { %v695_v39 = vpop.permute.xlu0 %694 }
  0xc0   : > { %v789_v41 = vpop.permute.xlu1 %788  ;;  %v939_v28 = vsel %vm934_vm1, %v610_v25, %v695_v39 }
  0xc1   : > { %v965_v12 = vsel %vm961_vm4, %v956_v10, %v789_v41 }
  0xc3   : > { %v819_v45 = vpop.permute.xlu0 %818 }
  0xc4   : > { %v913_v47 = vpop.permute.xlu1 %912  ;;  %v973_v0 = vsel %vm970_vm5, %v964_v63, %v819_v45 }
  0xc5   : > { %v999_v48 = vsel %vm997_vm8, %v990_v46, %v913_v47 }
  0xc6   : > { %1598 = vmatmul.mubr.msk.f32.vlgmr.msra.gmra.mxu0 %vm1018_vm9, %v999_v48 }
  0xc7   : > { %v697_v49 = vpop.permute.xlu0 %696 }
  0xc8   : > { %v727_v50 = vpop.permute.xlu1 %726  ;;  %v940_v39 = vsel %vm934_vm1, %v611_v34, %v697_v49 }
  0xc9   : > { %v948_v29 = vsel %vm943_vm2, %v939_v28, %v727_v50 }
  0xcb   : > { %v821_v51 = vpop.permute.xlu0 %820 }
  0xcc   : > { %v851_v52 = vpop.permute.xlu1 %850  ;;  %v974_v13 = vsel %vm970_vm5, %v965_v12, %v821_v51 }
  0xcd   : > { %v982_v2 = vsel %vm979_vm6, %v973_v0, %v851_v52 }
  0xcf   : > { %v729_v53 = vpop.permute.xlu0 %728 }
  0xd0   : > { %v759_v54 = vpop.permute.xlu1 %758  ;;  %v949_v42 = vsel %vm943_vm2, %v940_v39, %v729_v53  ;;  %v612_v53 = vld [vmem:[%s1967_s24 + $0x60] sm:$0xff] }
  0xd1   : > { %v957_v31 = vsel %vm952_vm3, %v948_v29, %v759_v54  ;;  %v613_v54 = vld [vmem:[%s1967_s24 + $0x70] sm:$0xff]  ;;  %s2229_s24 = sand.u32 1, %s2389_s11   ;;  %s1693_s11 = scalar_lea.vmem %s2241_s2, 16 }
  0xd2   : > { %p1694_p12 = scmp.ne.s32.totalorder %s2241_s2, %s1693_s11  ;;  %p1701_p2 = scmp.lt.s32.totalorder %s1699_s4, %s1693_s11 }
  0xd3   : > { %v853_v56 = vpop.permute.xlu0 %852 }
  0xd4   : > { %v883_v57 = vpop.permute.xlu1 %882  ;;  %v983_v14 = vsel %vm979_vm6, %v974_v13, %v853_v56  ;;  %p1695_p13 = pnand %p1694_p12, %p1935_p4  ;;  %p1702_p3 = por %p1701_p2, %p1700_p1 }
  0xd5   : > { %v991_v4 = vsel %vm988_vm7, %v982_v2, %v883_v57 }
  0xd6   : > { %p1696_p0 = pneg %p1695_p13 }
  0xd7   : > { %v761_v60 = vpop.permute.xlu0 %760 }
  0xd8   : > { %v791_v62 = vpop.permute.xlu1 %790  ;;  %v958_v43 = vsel %vm952_vm3, %v949_v42, %v761_v60  ;;  %p1703_p5 = pnand %p1702_p3, %p1696_p0 }
  0xd9   : > { %v966_v33 = vsel %vm961_vm4, %v957_v31, %v791_v62 }
  0xdb   : > { %v885_v3 = vpop.permute.xlu0 %884 }
  0xdc   : > { %v915_v5 = vpop.permute.xlu1 %914  ;;  %v992_v17 = vsel %vm988_vm7, %v983_v14, %v885_v3  ;;  %v1552_v14 = vld [vmem:[%s2352_s7] ss:$0 sm:$0xff] }
  0xdd   : > { %v1000_v6 = vsel %vm997_vm8, %v991_v4, %v915_v5 }
  0xde   : > { %1600 = vmatprep.mubr.msk.f32.mxu0 %vm1018_vm9, %v1000_v6 }
  0xdf   : > { %v699_v9 = vpop.permute.xlu0 %698 }
  0xe0   : > { %v793_v11 = vpop.permute.xlu1 %792  ;;  %v941_v57 = vsel %vm934_vm1, %v612_v53, %v699_v9 }
  0xe1   : > { %v967_v45 = vsel %vm961_vm4, %v958_v43, %v793_v11 }
  0xe3   : > { %v823_v16 = vpop.permute.xlu0 %822 }
  0xe4   : > { %v917_v15 = vpop.permute.xlu1 %916  ;;  %v975_v35 = vsel %vm970_vm5, %v966_v33, %v823_v16 }
  0xe5   : > { %v1001_v18 = vsel %vm997_vm8, %v992_v17, %v917_v15 }
  0xe6   : > { %1601 = vmatmul.mubr.msk.f32.gmra.mxu0 %vm1018_vm9, %v1001_v18 }
  0xe7   : > { %v701_v19 = vpop.permute.xlu0 %700 }
  0xe8   : > { %v731_v20 = vpop.permute.xlu1 %730  ;;  %v942_v58 = vsel %vm934_vm1, %v613_v54, %v701_v19 }
  0xe9   : > { %v950_v59 = vsel %vm943_vm2, %v941_v57, %v731_v20 }
  0xeb   : > { %v825_v21 = vpop.permute.xlu0 %824 }
  0xec   : > { %v855_v22 = vpop.permute.xlu1 %854  ;;  %v976_v47 = vsel %vm970_vm5, %v967_v45, %v825_v21 }
  0xed   : > { %v984_v36 = vsel %vm979_vm6, %v975_v35, %v855_v22 }
  0xef   : > { %v733_v23 = vpop.permute.xlu0 %732 }
  0xf0   : > { %v763_v24 = vpop.permute.xlu1 %762  ;;  %v951_v60 = vsel %vm943_vm2, %v942_v58, %v733_v23 }
  0xf1   : > { %v959_v61 = vsel %vm952_vm3, %v950_v59, %v763_v24 }
  0xf3   : > { %v857_v26 = vpop.permute.xlu0 %856 }
  0xf4   : > { %v887_v27 = vpop.permute.xlu1 %886  ;;  %v985_v48 = vsel %vm979_vm6, %v976_v47, %v857_v26 }
  0xf5   : > { %v993_v38 = vsel %vm988_vm7, %v984_v36, %v887_v27 }
  0xf7   : > { %v765_v30 = vpop.permute.xlu0 %764 }
  0xf8   : > { %v795_v32 = vpop.permute.xlu1 %794  ;;  %v960_v63 = vsel %vm952_vm3, %v951_v60, %v765_v30 }
  0xf9   : > { %v968_v0 = vsel %vm961_vm4, %v959_v61, %v795_v32 }
  0xfb   : > { %v889_v37 = vpop.permute.xlu0 %888 }
  0xfc   : > { %v919_v40 = vpop.permute.xlu1 %918  ;;  %v994_v50 = vsel %vm988_vm7, %v985_v48, %v889_v37 }
  0xfd   : > { %v1002_v41 = vsel %vm997_vm8, %v993_v38, %v919_v40 }
  0xfe   : > { %1603 = vmatprep.mubr.msk.f32.mxu1 %vm1018_vm9, %v1002_v41 }
  0xff   : > { %v797_v44 = vpop.permute.xlu0 %796 }
 0x100   : > { %v827_v46 = vpop.permute.xlu1 %826  ;;  %v969_v2 = vsel %vm961_vm4, %v960_v63, %v797_v44 }
 0x101   : > { %v977_v3 = vsel %vm970_vm5, %v968_v0, %v827_v46 }
 0x103   : > { %v921_v49 = vpop.permute.xlu0 %920 }
 0x104   : > { %v1003_v51 = vsel %vm997_vm8, %v994_v50, %v921_v49  ;;  %v829_v52 = vpop.permute.xlu1 %828 }
 0x105   : > { %1604 = vmatmul.mubr.msk.f32.vlgmr.msra.gmra.mxu1 %vm1018_vm9, %v1003_v51  ;;  %v978_v4 = vsel %vm970_vm5, %v969_v2, %v829_v52 }
 0x107   : > { %v859_v55 = vpop.permute.xlu0 %858 }
 0x108   : > { %v861_v56 = vpop.permute.xlu1 %860  ;;  %v986_v5 = vsel %vm979_vm6, %v977_v3, %v859_v55 }
 0x109   : > { %v987_v6 = vsel %vm979_vm6, %v978_v4, %v861_v56 }
 0x10b   : > { %v891_v62 = vpop.permute.xlu0 %890 }
 0x10c   : > { %v893_v1 = vpop.permute.xlu1 %892  ;;  %v995_v7 = vsel %vm988_vm7, %v986_v5, %v891_v62 }
 0x10d   : > { %v996_v9 = vsel %vm988_vm7, %v987_v6, %v893_v1 }
 0x10f   : > { %v923_v8 = vpop.permute.xlu0 %922 }
 0x110   : > { %v1004_v10 = vsel %vm997_vm8, %v995_v7, %v923_v8  ;;  %v925_v11 = vpop.permute.xlu1 %924 }
 0x111   : > { %v1005_v12 = vsel %vm997_vm8, %v996_v9, %v925_v11  ;;  %1606 = vmatprep.mubr.msk.f32.mxu1 %vm1018_vm9, %v1004_v10 }
 0x112   : > { %1607 = vmatmul.mubr.msk.f32.gmra.mxu1 %vm1018_vm9, %v1005_v12 }
 0x186   : > { %v1599_v13 = vpop.f32.mrf.mxu0 }
 0x187   : > { %v1119_v17 = vadd.f32 %v1599_v13, %v1552_v14 }
 0x188   : > { %v1113_v16 = vpop.f32.mrf.mxu0 }
 0x189   : > { %v1114_v15 = vadd.f32 %v1552_v14, %v1113_v16  ;;  %v1161_v19 = vmul.f32 0.01, %v1119_v17  ;;  %vm1153_vm11 = vcmp.gt.f32.partialorder %v1119_v17, 0.0 }
 0x18b   : > { %v1160_v18 = vmul.f32 0.01, %v1114_v15  ;;  %vm1152_vm10 = vcmp.gt.f32.partialorder %v1114_v15, 0.0  ;;  %v1169_v21 = vsel %vm1153_vm11, %v1119_v17, %v1161_v19 }
 0x18c   : > { %v1191_v36 = vmul.f32 %v1169_v21, %v1169_v21 }
 0x18d   : > { %v1168_v20 = vsel %vm1152_vm10, %v1114_v15, %v1160_v18 }
 0x18e   : > { %1212 = vxpose.xlu0.b32.start [1/8] (short) (narrow) %v1168_v20, 8  ;;  %v1190_v34 = vmul.f32 %v1168_v20, %v1168_v20  ;;  %v1176_v37 = vadd.f32 %v1169_v21, %v1168_v20 }
 0x190   : > { %v1198_v41 = vadd.f32 %v1191_v36, %v1190_v34 }
 0x192   : > { %1213 = vxpose.xlu0.b32.cont [2/8] (short) (narrow) %v1169_v21, 8 }
 0x1a6   : > { %v1602_v22 = vpop.f32.mrf.mxu0 }
 0x1a7   : > { %v1129_v24 = vadd.f32 %v1602_v22, %v1552_v14 }
 0x1a8   : > { %v1123_v23 = vpop.f32.mrf.mxu0 }
 0x1a9   : > { %v1124_v25 = vadd.f32 %v1552_v14, %v1123_v23  ;;  %v1163_v27 = vmul.f32 0.01, %v1129_v24  ;;  %vm1155_vm13 = vcmp.gt.f32.partialorder %v1129_v24, 0.0 }
 0x1ab   : > { %v1162_v26 = vmul.f32 0.01, %v1124_v25  ;;  %vm1154_vm12 = vcmp.gt.f32.partialorder %v1124_v25, 0.0  ;;  %v1171_v29 = vsel %vm1155_vm13, %v1129_v24, %v1163_v27 }
 0x1ac   : > { %v1193_v45 = vmul.f32 %v1171_v29, %v1171_v29 }
 0x1ad   : > { %v1170_v28 = vsel %vm1154_vm12, %v1124_v25, %v1162_v26 }
 0x1ae   : > { %1214 = vxpose.xlu0.b32.cont [3/8] (short) (narrow) %v1170_v28, 8  ;;  %v1192_v38 = vmul.f32 %v1170_v28, %v1170_v28  ;;  %v1177_v42 = vadd.f32 %v1176_v37, %v1170_v28 }
 0x1b0   : > { %v1199_v43 = vadd.f32 %v1198_v41, %v1192_v38  ;;  %v1178_v46 = vadd.f32 %v1177_v42, %v1171_v29 }
 0x1b2   : > { %1215 = vxpose.xlu0.b32.cont [4/8] (short) (narrow) %v1171_v29, 8  ;;  %v1200_v49 = vadd.f32 %v1199_v43, %v1193_v45 }
 0x1c5   : > { %v1605_v30 = vpop.f32.mrf.mxu1 }
 0x1c6   : > { %v1139_v32 = vadd.f32 %v1605_v30, %v1552_v14 }
 0x1c7   : > { %v1133_v31 = vpop.f32.mrf.mxu1 }
 0x1c8   : > { %v1134_v33 = vadd.f32 %v1552_v14, %v1133_v31  ;;  %v1165_v40 = vmul.f32 0.01, %v1139_v32  ;;  %vm1157_vm15 = vcmp.gt.f32.partialorder %v1139_v32, 0.0 }
 0x1ca   : > { %v1164_v35 = vmul.f32 0.01, %v1134_v33  ;;  %vm1156_vm14 = vcmp.gt.f32.partialorder %v1134_v33, 0.0  ;;  %v1173_v44 = vsel %vm1157_vm15, %v1139_v32, %v1165_v40 }
 0x1cb   : > { %v1195_v57 = vmul.f32 %v1173_v44, %v1173_v44 }
 0x1cc   : > { %v1172_v39 = vsel %vm1156_vm14, %v1134_v33, %v1164_v35 }
 0x1cd   : > { %1216 = vxpose.xlu0.b32.cont [5/8] (short) (narrow) %v1172_v39, 8  ;;  %v1194_v47 = vmul.f32 %v1172_v39, %v1172_v39  ;;  %v1179_v51 = vadd.f32 %v1178_v46, %v1172_v39 }
 0x1cf   : > { %v1201_v55 = vadd.f32 %v1200_v49, %v1194_v47  ;;  %v1180_v58 = vadd.f32 %v1179_v51, %v1173_v44 }
 0x1d1   : > { %1217 = vxpose.xlu0.b32.cont [6/8] (short) (narrow) %v1173_v44, 8  ;;  %v1202_v61 = vadd.f32 %v1201_v55, %v1195_v57 }
 0x1d2   : > { %v1608_v48 = vpop.f32.mrf.mxu1 }
 0x1d3   : > { %v1149_v50 = vadd.f32 %v1608_v48, %v1552_v14 }
 0x1d4   : > { %v1143_v52 = vpop.f32.mrf.mxu1 }
 0x1d5   : > { %v1167_v53 = vmul.f32 0.01, %v1149_v50  ;;  %v1144_v54 = vadd.f32 %v1552_v14, %v1143_v52  ;;  %vm1159_vm0 = vcmp.gt.f32.partialorder %v1149_v50, 0.0 }
 0x1d7   : > { %v1166_v56 = vmul.f32 0.01, %v1144_v54  ;;  %vm1158_vm1 = vcmp.gt.f32.partialorder %v1144_v54, 0.0  ;;  %v1175_v60 = vsel %vm1159_vm0, %v1149_v50, %v1167_v53 }
 0x1d8   : > { %v1197_v1 = vmul.f32 %v1175_v60, %v1175_v60 }
 0x1d9   : > { %v1174_v59 = vsel %vm1158_vm1, %v1144_v54, %v1166_v56 }
 0x1da   : > { %v1196_v62 = vmul.f32 %v1174_v59, %v1174_v59  ;;  %1218 = vxpose.xlu0.b32.cont [7/8] (short) (narrow) %v1174_v59, 8  ;;  %v1181_v63 = vadd.f32 %v1180_v58, %v1174_v59 }
 0x1dc   : > { %v1203_v0 = vadd.f32 %v1202_v61, %v1196_v62  ;;  %v1182_v2 = vadd.f32 %v1181_v63, %v1175_v60 }
 0x1de   : > { %1219 = vxpose.xlu0.b32.end [8/8] (short) (narrow) %v1175_v60, 8  ;;  %v1183_v3 = vrot.slane %v1182_v2, 4  ;;  %v1204_v4 = vadd.f32 %v1203_v0, %v1197_v1 }
 0x1e0   : > { %v1184_v5 = vadd.f32 %v1183_v3, %v1182_v2  ;;  %v1205_v6 = vrot.slane %v1204_v4, 4 }
 0x1e2   : > { %v1185_v7 = vrot.slane %v1184_v5, 2  ;;  %v1206_v8 = vadd.f32 %v1205_v6, %v1204_v4 }
 0x1e4   : > { %v1207_v9 = vrot.slane %v1206_v8, 2  ;;  %v1186_v10 = vadd.f32 %v1185_v7, %v1184_v5 }
 0x1e6   : > { %v1187_v11 = vrot.slane %v1186_v10, 1  ;;  %v1208_v12 = vadd.f32 %v1207_v9, %v1206_v8 }
 0x1e8   : > { %v1188_v13 = vadd.f32 %v1187_v11, %v1186_v10  ;;  %v1209_v14 = vrot.slane %v1208_v12, 1 }
 0x1ea   : > { %1189 = vst [vmem:[%s533_s29] sm:$0x1] %v1188_v13  ;;  %v1210_v16 = vadd.f32 %v1209_v14, %v1208_v12 }
 0x1eb   : > { %1706 = shalt.err (!%p1703_p5)
}
 0x1ec   : > { %s1707_s27 = scalar_lea.hbm %s2239_s28, 16  ;;  %s1711_s20 = scalar_lea.hbm %s2354_s9, 32 }
 0x1ed   : > { %p1708_p6 = scmp.ne.s32.totalorder %s2239_s28, %s1707_s27  ;;  %p1712_p10 = scmp.lt.s32.totalorder %s2239_s28, %s2354_s9 }
 0x1ee   : > { %p1713_p11 = scmp.lt.s32.totalorder %s1711_s20, %s1707_s27 }
 0x1ef   : > { %p1709_p7 = pnand %p1708_p6, %p1935_p4 }
 0x1f0   : > { %p1714_p12 = por %p1713_p11, %p1712_p10 }
 0x1f1   : > { %p1710_p9 = pneg %p1709_p7 }
 0x1f3   : > { %p1715_p13 = pnand %p1714_p12, %p1710_p9 }
 0x1f5   : > { %1718 = shalt.err (!%p1715_p13)
}
 0x1f6   : > { %s2390_s4 = scalar_lea.sflag [#allocation5], %s2229_s24  ;;  %s2391_s11 = scalar_lea.vmem [#allocation6], %s2225_s19 }
 0x1f7   : > { %1620 = dma.vmem_to_hbm [thread:$0]  (%p1935_p4), %s2241_s2, 16, %s2239_s28, %s2390_s4   ;;  %1211 = vst [vmem:[%s2391_s11] sm:$0x1] %v1210_v16 }
 0x1f8   : > { %s1719_s1 = scalar_lea.vmem %s2248_s22, 16  ;;  %s1836_s30 = smov [#allocation6]  }
 0x1f9   : > { %p1720_p0 = scmp.ne.s32.totalorder %s2248_s22, %s1719_s1  ;;  %s1723_s27 = sshll.u32 %s1836_s30, 4  ;;  %s1724_s27 = int_to_ptr.vmem [resolvable:$false] %s1723_s27 }
 0x1fa   : > { %s1725_s29 = scalar_lea.vmem %s1724_s27, 32  ;;  %p1726_p3 = scmp.lt.s32.totalorder %s2248_s22, %s1724_s27 }
 0x1fb   : > { %p1721_p1 = pnand %p1720_p0, %p1935_p4  ;;  %p1727_p5 = scmp.lt.s32.totalorder %s1725_s29, %s1719_s1 }
 0x1fd   : > { %p1722_p2 = pneg %p1721_p1  ;;  %p1728_p6 = por %p1727_p5, %p1726_p3 }
 0x1ff   : > { %p1729_p7 = pnand %p1728_p6, %p1722_p2 }
 0x201   : > { %1732 = shalt.err (!%p1729_p7)
}
 0x202   : > { %s1733_s2 = scalar_lea.hbm %s2246_s0, 16  ;;  %s1737_s20 = scalar_lea.hbm %s2355_s10, 32 }
 0x203   : > { %p1734_p9 = scmp.ne.s32.totalorder %s2246_s0, %s1733_s2  ;;  %p1738_p12 = scmp.lt.s32.totalorder %s2246_s0, %s2355_s10 }
 0x204   : > { %p1739_p13 = scmp.lt.s32.totalorder %s1737_s20, %s1733_s2 }
 0x205   : > { %p1735_p10 = pnand %p1734_p9, %p1935_p4 }
 0x206   : > { %p1740_p0 = por %p1739_p13, %p1738_p12 }
 0x207   : > { %p1736_p11 = pneg %p1735_p10 }
 0x209   : > { %p1741_p1 = pnand %p1740_p0, %p1736_p11 }
 0x20b   : > { %1744 = shalt.err (!%p1741_p1)
}
 0x20c   : > { %s2392_s11 = scalar_lea.sflag [#allocation5], %s2229_s24  ;;  %s1539_s1 = sshll.u32 %s2225_s19, 3  ;;  %vm1244_vm2 = vcmask 523264  }
 0x20d   : > { %1621 = dma.vmem_to_hbm [thread:$0]  (%p1935_p4), %s2248_s22, 16, %s2246_s0, %s2392_s11  }
 0x20e   : > { %s1563_s30 = sshll.u32 %s1817_s16, 7  ;;  %s527_s27 = scalar_lea.vmem [#allocation2], %s1539_s1 }
 0x20f   : > { %s1269_s29 = sshll.u32 %s527_s27, 4  ;;  %s2302_s12 = scalar_lea.hbm %s2353_s8, %s1563_s30  ;;  %s1270_s29 = int_to_ptr.vmem [resolvable:$true] %s1269_s29 }
 0x210   : > { %s1247_s24 = scalar_lea.sflag [#allocation3], %s2225_s19  ;;  %s1745_s20 = scalar_lea.vmem %s1270_s29, 128 }
 0x211   : > { %p1746_p2 = scmp.ne.s32.totalorder %s1270_s29, %s1745_s20  ;;  %s1837_s22 = smov [#allocation2]  }
 0x212   : > { %s1749_s0 = sshll.u32 %s1837_s22, 4  ;;  %s1750_s0 = int_to_ptr.vmem [resolvable:$false] %s1749_s0 }
 0x213   : > { %p1747_p3 = pnand %p1746_p2, %p1935_p4  ;;  %s1751_s16 = scalar_lea.vmem %s1750_s0, 256 }
 0x214   : > { %p1752_p6 = scmp.lt.s32.totalorder %s1270_s29, %s1750_s0  ;;  %p1753_p7 = scmp.lt.s32.totalorder %s1751_s16, %s1745_s20 }
 0x215   : > { %p1748_p5 = pneg %p1747_p3 }
 0x216   : > { %p1754_p9 = por %p1753_p7, %p1752_p6 }
 0x218   : > { %p1755_p10 = pnand %p1754_p9, %p1748_p5 }
 0x23e   : > { %v1228_v17 = vpop.trf.xlu0 }
 0x23f   : > { %1245 = vst.msk [vmem:[%s527_s27] sm:$0xff] %vm1244_vm2, %v1228_v17 }
 0x240   : > { %1758 = shalt.err (!%p1755_p10)
}
 0x241   : > { %s1759_s3 = scalar_lea.hbm %s2302_s12, 128  ;;  %s1763_s11 = scalar_lea.hbm %s2353_s8, 256 }
 0x242   : > { %p1760_p11 = scmp.ne.s32.totalorder %s2302_s12, %s1759_s3  ;;  %p1764_p0 = scmp.lt.s32.totalorder %s2302_s12, %s2353_s8 }
 0x243   : > { %p1765_p1 = scmp.lt.s32.totalorder %s1763_s11, %s1759_s3 }
 0x244   : > { %p1761_p12 = pnand %p1760_p11, %p1935_p4 }
 0x245   : > { %p1766_p2 = por %p1765_p1, %p1764_p0 }
 0x246   : > { %p1762_p13 = pneg %p1761_p12 }
 0x248   : > { %p1767_p3 = pnand %p1766_p2, %p1762_p13 }
 0x24a   : > { %1770 = shalt.err (!%p1767_p3)
}
 0x24b   : > { %1619 = dma.vmem_to_hbm [thread:$0]  (%p1935_p4), %s1270_s29, 128, %s2302_s12, %s1247_s24  }
 0x24c PF: > { %p1635_p5 = scmp.ge.s32.totalorder %s1825_s18, 2  ;;  %s1309_s27 = sand.u32 1, %s1805_s13  }
 0x24d   : > { %s1310_s2 = scalar_lea.sflag [#allocation3], %s1309_s27 }
 0x24e   : > { %p1626_p6 = pnand %p1635_p5, %p1944_p8 }
 0x250   : > { %p1627_p7 = pneg %p1626_p6 }
 0x252   : > { %1796 = dma.done.wait (%p1627_p7), %s1310_s2, 128  }
 0x253   : > { %1798 = vsyncadd (%p1627_p7), %s1310_s2, 4294967168  ;;  %s2393_s28 = sadd.s32 4294967294, %s1825_s18  }
 0x254   : > { %s1318_s20 = sand.u32 1, %s2393_s28  }
 0x255   : > { %s1319_s22 = scalar_lea.sflag [#allocation5], %s1318_s20 }
 0x256   : > { %1800 = dma.done.wait (%p1627_p7), %s1319_s22, 32  }
 0x257   : > { %1802 = vsyncadd (%p1627_p7), %s1319_s22, 4294967264  ;;  %s27_s18 = sadd.s32 1, %s1825_s18   ;;  %s2394_s13 = smov %s1809_s14 }
 0x258   : > { %p24_p4 = scmp.ge.s32.totalorder %s27_s18, 4   ;;  %s2395_s14 = smov %s1813_s15 }
 0x259   : > { %s2396_s15 = smov %s1950_s26  ;;  %s2397_s16 = smov %s1821_s17 }
 0x25a   : > { %s2398_s17 = smov %s2400_s21  ;;  %26 = sbr.rel (!%p24_p4) target bundleno = 12 (0xc), region = 134 }
 0x25f   :  { %1331 = vsyncpa [#allocation3], 1 }
 0x260   :  { %1333 = vsyncpa [#allocation3 + $0x1], 1 }
 0x261   :  { %1334 = vsyncpa [#allocation5], 1 }
 0x262   :  { %1336 = vsyncpa [#allocation5 + $0x1], 1 }

</bundles_post_ra>
